<compile_context>
chip_gen: v7x
topology: tpu7x:2x2x1
jax: 0.10.0
libtpu: 0.0.40
codegen_flags: <defaults>
</compile_context>

<pallas_src>
import jax
import jax.numpy as jnp
import numpy as np
from jax.experimental import pallas as pl
from jax.experimental.pallas import tpu as pltpu


def spatial_decoder_kernel(x_ref, m_ref, h_ref, adjt_ref,
                           w_in_x_ref, w_in_m_ref, b_in_ref,
                           w_h_stack_ref,
                           w_gc_fused_ref, b_out_ref,
                           w_ro_o_ref, w_ro_h_ref, b_ro_ref,
                           alpha_ref,
                           yro_ref, ycat_ref):
    """One grid step = one batch element, channels-first [C, N] throughout."""
    f32 = jnp.float32
    bf16 = jnp.bfloat16

    x = x_ref[0].astype(bf16)                    # [c_x, N]
    m = m_ref[0].astype(bf16)                    # [c_m, N]
    h_f32 = h_ref[0]                             # [d_model, N] float32
    h = h_f32.astype(bf16)

    d_model = h_f32.shape[0]
    n_support = adjt_ref.shape[0]

    # Stacked h projections: rows [0:d] = W_in[:, h-cols], rows [d:2d] = W_out[:, h-cols].
    hproj = jnp.dot(w_h_stack_ref[...], h, preferred_element_type=f32)   # [2*d_model, N]
    h_in = hproj[0:d_model, :]
    h_out = hproj[d_model:2 * d_model, :]

    # lin_in on cat([x, m, h], channels)  ==  split-weight matmuls (no concat).
    z = (jnp.dot(w_in_x_ref[...], x, preferred_element_type=f32)
         + jnp.dot(w_in_m_ref[...], m, preferred_element_type=f32)
         + h_in
         + b_in_ref[...])                        # [d_model, N] f32

    # graph_conv (order=1, include_self=False) fused with its 1x1 mlp AND with
    # lin_out's gc-columns (folded in the wrapper):
    #   W_out_gc @ gc = sum_s ((W_out_gc @ W_gc_s) @ z) @ A_s^T
    # One stacked matmul replaces the S per-support mlp matmuls; the remaining
    # per-support matmuls use sublane-aligned row slices (d_model % 8 == 0).
    zw = jnp.dot(w_gc_fused_ref[...], z.astype(bf16),
                 preferred_element_type=f32)     # [S*d_model, N] f32
    zw = zw.astype(bf16)
    o = jnp.dot(zw[0:d_model, :], adjt_ref[0], preferred_element_type=f32)
    for s in range(1, n_support):
        o = o + jnp.dot(zw[s * d_model:(s + 1) * d_model, :], adjt_ref[s],
                        preferred_element_type=f32)

    # Remaining lin_out terms (graph_conv bias pre-folded into b_out), then PReLU (f32).
    o = o + h_out + b_out_ref[...]               # [d_model, N] f32
    alpha = alpha_ref[0]                         # PReLU scalar, read from SMEM
    o = jnp.where(o >= 0, o, alpha * o)

    # out = cat([o, h], channels): two aligned row-slice stores, no vreg concat.
    ycat_ref[0, 0:d_model, :] = o
    ycat_ref[0, d_model:2 * d_model, :] = h_f32

    # read_out on cat([o, h], channels)  ==  split-weight matmuls.
    yro = (jnp.dot(w_ro_o_ref[...], o.astype(bf16), preferred_element_type=f32)
           + jnp.dot(w_ro_h_ref[...], h, preferred_element_type=f32)
           + b_ro_ref[...])                      # [d_out, N] f32
    yro_ref[0] = yro


def spatial_decoder(x, m, h, adj, params):
    """Inputs in native PyTorch NCW layout: x [B,c_x,N], m [B,c_m,N],
    h [B,d_model,N]; adj [S,N,N].  Returns (read_out(out), out) in NCW,
    matching SpatialDecoder.forward with order=1, attention_block=False, u=None."""
    B, c_x, N = x.shape
    c_m = m.shape[1]
    d_model = h.shape[1]
    S = adj.shape[0]
    d_out = params["w_ro"].shape[0]
    bf16 = jnp.bfloat16
    f32 = jnp.float32

    # ---- one-time parameter prep (tiny; cache outside the step fn in practice) ----
    w_in = params["w_in"]                                     # [d_model, d_in]
    w_in_x = w_in[:, :c_x].astype(bf16)
    w_in_m = w_in[:, c_x:c_x + c_m].astype(bf16)
    w_in_h = w_in[:, c_x + c_m:]                              # [d_model, d_model]
    b_in = params["b_in"].reshape(d_model, 1).astype(f32)

    w_out = params["w_out"]                                   # [d_model, 2*d_model]
    w_out_gc = w_out[:, :d_model]
    w_out_h = w_out[:, d_model:]

    # Stack the two d_model-row projections of h into one matmul operand.
    w_h_stack = jnp.concatenate([w_in_h, w_out_h], axis=0).astype(bf16)   # [2*d_model, d_model]

    # graph_conv.mlp weight [d_model, S*d_model]: fold lin_out's gc-columns into each
    # per-support block and restack on rows so the kernel does ONE [S*d, d] @ [d, N] matmul.
    w_gc = params["w_gc"]
    w_gc_fused = jnp.concatenate(
        [w_out_gc @ w_gc[:, s * d_model:(s + 1) * d_model] for s in range(S)], axis=0
    ).astype(bf16)                                            # [S*d_model, d_model]

    # Fold graph_conv bias into lin_out bias: b_out' = b_out + W_out[:, :d] @ b_gc.
    b_out = (params["b_out"] + w_out_gc @ params["b_gc"]).reshape(d_model, 1).astype(f32)

    w_ro = params["w_ro"]                                     # [d_out, 2*d_model]
    w_ro_o = w_ro[:, :d_model].astype(bf16)
    w_ro_h = w_ro[:, d_model:].astype(bf16)
    b_ro = params["b_ro"].reshape(d_out, 1).astype(f32)

    alpha = params["alpha"].reshape(1).astype(f32)            # PReLU scalar -> SMEM

    # Pre-transpose supports:  (z @ A^T)[c, w] = sum_v z[c, v] * A[w, v].
    adj_t = jnp.swapaxes(adj, -1, -2).astype(bf16)            # [S, N, N]

    def wspec(shape):
        return pl.BlockSpec(shape, lambda b: (0, 0))

    yro, ycat = pl.pallas_call(
        spatial_decoder_kernel,
        out_shape=(jax.ShapeDtypeStruct((B, d_out, N), f32),
                   jax.ShapeDtypeStruct((B, 2 * d_model, N), f32)),
        grid_spec=pltpu.PrefetchScalarGridSpec(
            num_scalar_prefetch=0,
            grid=(B,),
            in_specs=[
                pl.BlockSpec((1, c_x, N), lambda b: (b, 0, 0)),        # x
                pl.BlockSpec((1, c_m, N), lambda b: (b, 0, 0)),        # m
                pl.BlockSpec((1, d_model, N), lambda b: (b, 0, 0)),    # h
                pl.BlockSpec((S, N, N), lambda b: (0, 0, 0)),          # adj^T (resident)
                wspec((d_model, c_x)),                                 # W_in[:, x]
                wspec((d_model, c_m)),                                 # W_in[:, m]
                wspec((d_model, 1)),                                   # b_in
                wspec((2 * d_model, d_model)),                         # [W_in_h; W_out_h]
                wspec((S * d_model, d_model)),                         # W_out_gc @ W_gc (stacked)
                wspec((d_model, 1)),                                   # b_out (+ folded b_gc)
                wspec((d_out, d_model)),                               # W_ro[:, o]
                wspec((d_out, d_model)),                               # W_ro[:, h]
                wspec((d_out, 1)),                                     # b_ro
                pl.BlockSpec(memory_space=pltpu.MemorySpace.SMEM),     # PReLU alpha
            ],
            out_specs=[
                pl.BlockSpec((1, d_out, N), lambda b: (b, 0, 0)),          # read_out
                pl.BlockSpec((1, 2 * d_model, N), lambda b: (b, 0, 0)),    # out = cat([o, h])
            ],
        ),
        compiler_params=pltpu.CompilerParams(
            dimension_semantics=("parallel",),
        ),
    )(x, m, h, adj_t,
      w_in_x, w_in_m, b_in,
      w_h_stack,
      w_gc_fused, b_out,
      w_ro_o, w_ro_h, b_ro,
      alpha)

    return yro, ycat


def ref_forward(x, m, h, adj, p):
    """Pure-f32 JAX reference of SpatialDecoder.forward (order=1, u=None)."""
    xin = jnp.concatenate([x, m, h], axis=1)                              # [B, d_in, N]
    z = jnp.einsum("oi,bin->bon", p["w_in"], xin) + p["b_in"][None, :, None]
    sup = [jnp.einsum("bcv,wv->bcw", z, adj[s]) for s in range(adj.shape[0])]
    cat = jnp.concatenate(sup, axis=1)                                    # [B, S*d, N]
    gc = jnp.einsum("oi,bin->bon", p["w_gc"], cat) + p["b_gc"][None, :, None]
    o = (jnp.einsum("oi,bin->bon", p["w_out"], jnp.concatenate([gc, h], axis=1))
         + p["b_out"][None, :, None])
    o = jnp.where(o >= 0, o, p["alpha"] * o)
    ycat = jnp.concatenate([o, h], axis=1)
    yro = jnp.einsum("oi,bin->bon", p["w_ro"], ycat) + p["b_ro"][None, :, None]
    return yro, ycat


if __name__ == "__main__":
    # Small shapes consistent with the module (input_size=4, hidden=32, 16 nodes).
    B, N = 2, 16
    c_x = c_m = 4                         # input_size channels; mask matches x
    d_model = 32
    d_out = c_x
    support_len = 2
    d_in = c_x + c_m + d_model            # x, m, h concatenated on channels (u=None)

    key = jax.random.PRNGKey(0)
    ks = jax.random.split(key, 12)

    # PyTorch Conv1d weights [out, in, 1] kept directly as [out, in] (k=1 squeezed).
    params = {
        "w_in":  0.1 * jax.random.normal(ks[0], (d_model, d_in), jnp.float32),
        "b_in":  0.1 * jax.random.normal(ks[1], (d_model,), jnp.float32),
        "w_gc":  0.1 * jax.random.normal(ks[2], (d_model, support_len * d_model), jnp.float32),
        "b_gc":  0.1 * jax.random.normal(ks[3], (d_model,), jnp.float32),
        "w_out": 0.1 * jax.random.normal(ks[4], (d_model, 2 * d_model), jnp.float32),
        "b_out": 0.1 * jax.random.normal(ks[5], (d_model,), jnp.float32),
        "alpha": jnp.full((1,), 0.25, jnp.float32),      # nn.PReLU default init
        "w_ro":  0.1 * jax.random.normal(ks[6], (d_out, 2 * d_model), jnp.float32),
        "b_ro":  0.1 * jax.random.normal(ks[7], (d_out,), jnp.float32),
    }

    # Inputs in PyTorch NCW layout.
    x = jax.random.normal(ks[8], (B, c_x, N), jnp.float32)
    m = (jax.random.uniform(ks[9], (B, c_m, N)) > 0.5).astype(jnp.float32)
    h = jax.random.normal(ks[10], (B, d_model, N), jnp.float32)
    # Row-normalized random supports (forward / backward transition matrices).
    raw = jax.random.uniform(ks[11], (support_len, N, N), jnp.float32)
    adj = raw / jnp.sum(raw, axis=-1, keepdims=True)

    yro, ycat = jax.jit(spatial_decoder)(x, m, h, adj, params)
    jax.block_until_ready((yro, ycat))

    yro_ref, ycat_ref = ref_forward(x, m, h, adj, params)
    # Kernel uses bf16 MXU operands with f32 accumulation (plus wrapper-side weight
    # folding), so compare against the pure-f32 reference with a bf16-sized tolerance
    # (structural bugs give O(1) errors).
    np.testing.assert_allclose(np.asarray(yro), np.asarray(yro_ref), rtol=5e-2, atol=5e-2)
    np.testing.assert_allclose(np.asarray(ycat), np.asarray(ycat_ref), rtol=5e-2, atol=5e-2)

    print("KERNEL_OK")
</pallas_src>

<mosaic_0001>
module attributes {stable_mosaic.version = 11 : i64} {
  func.func @spatial_decoder_kernel(%arg0: i32, %arg1: memref<1x4x16xf32, #tpu.memory_space<vmem>>, %arg2: memref<1x4x16xf32, #tpu.memory_space<vmem>>, %arg3: memref<1x32x16xf32, #tpu.memory_space<vmem>>, %arg4: memref<2x16x16xbf16, #tpu.memory_space<vmem>>, %arg5: memref<32x4xbf16, #tpu.memory_space<vmem>>, %arg6: memref<32x4xbf16, #tpu.memory_space<vmem>>, %arg7: memref<32x1xf32, #tpu.memory_space<vmem>>, %arg8: memref<64x32xbf16, #tpu.memory_space<vmem>>, %arg9: memref<64x32xbf16, #tpu.memory_space<vmem>>, %arg10: memref<32x1xf32, #tpu.memory_space<vmem>>, %arg11: memref<4x32xbf16, #tpu.memory_space<vmem>>, %arg12: memref<4x32xbf16, #tpu.memory_space<vmem>>, %arg13: memref<4x1xf32, #tpu.memory_space<vmem>>, %arg14: memref<1xf32, #tpu.memory_space<smem>>, %arg15: memref<1x4x16xf32, #tpu.memory_space<vmem>>, %arg16: memref<1x64x16xf32, #tpu.memory_space<vmem>>) attributes {dimension_semantics = [#tpu.dimension_semantics<parallel>], iteration_bounds = array<i64: 2>, scalar_prefetch = 0 : i64, scratch_operands = 0 : i64, tpu.core_type = #tpu.core_type<tc>, window_params = [{transform_indices = @transform_0, window_bounds = array<i64: 1, 4, 16>}, {transform_indices = @transform_1, window_bounds = array<i64: 1, 4, 16>}, {transform_indices = @transform_2, window_bounds = array<i64: 1, 32, 16>}, {pipeline_mode = #tpu.pipeline_mode<synchronous>, transform_indices = @transform_3, window_bounds = array<i64: 2, 16, 16>}, {pipeline_mode = #tpu.pipeline_mode<synchronous>, transform_indices = @transform_4, window_bounds = array<i64: 32, 4>}, {pipeline_mode = #tpu.pipeline_mode<synchronous>, transform_indices = @transform_5, window_bounds = array<i64: 32, 4>}, {pipeline_mode = #tpu.pipeline_mode<synchronous>, transform_indices = @transform_6, window_bounds = array<i64: 32, 1>}, {pipeline_mode = #tpu.pipeline_mode<synchronous>, transform_indices = @transform_7, window_bounds = array<i64: 64, 32>}, {pipeline_mode = #tpu.pipeline_mode<synchronous>, transform_indices = @transform_8, window_bounds = array<i64: 64, 32>}, {pipeline_mode = #tpu.pipeline_mode<synchronous>, transform_indices = @transform_9, window_bounds = array<i64: 32, 1>}, {pipeline_mode = #tpu.pipeline_mode<synchronous>, transform_indices = @transform_10, window_bounds = array<i64: 4, 32>}, {pipeline_mode = #tpu.pipeline_mode<synchronous>, transform_indices = @transform_11, window_bounds = array<i64: 4, 32>}, {pipeline_mode = #tpu.pipeline_mode<synchronous>, transform_indices = @transform_12, window_bounds = array<i64: 4, 1>}, {transform_indices = @transform_13, window_bounds = array<i64: 1>}, {transform_indices = @transform_14, window_bounds = array<i64: 1, 4, 16>}, {transform_indices = @transform_15, window_bounds = array<i64: 1, 64, 16>}]} {
    %c0 = arith.constant 0 : index
    %c0_0 = arith.constant 0 : index
    %c0_1 = arith.constant 0 : index
    %0 = vector.load %arg1[%c0, %c0_0, %c0_1] : memref<1x4x16xf32, #tpu.memory_space<vmem>>, vector<1x4x16xf32>
    %1 = vector.shape_cast %0 : vector<1x4x16xf32> to vector<4x16xf32>
    %2 = arith.truncf %1 : vector<4x16xf32> to vector<4x16xbf16>
    %c0_2 = arith.constant 0 : index
    %c0_3 = arith.constant 0 : index
    %c0_4 = arith.constant 0 : index
    %3 = vector.load %arg2[%c0_2, %c0_3, %c0_4] : memref<1x4x16xf32, #tpu.memory_space<vmem>>, vector<1x4x16xf32>
    %4 = vector.shape_cast %3 : vector<1x4x16xf32> to vector<4x16xf32>
    %5 = arith.truncf %4 : vector<4x16xf32> to vector<4x16xbf16>
    %c0_5 = arith.constant 0 : index
    %c0_6 = arith.constant 0 : index
    %c0_7 = arith.constant 0 : index
    %6 = vector.load %arg3[%c0_5, %c0_6, %c0_7] : memref<1x32x16xf32, #tpu.memory_space<vmem>>, vector<1x32x16xf32>
    %7 = vector.shape_cast %6 : vector<1x32x16xf32> to vector<32x16xf32>
    %8 = arith.truncf %7 : vector<32x16xf32> to vector<32x16xbf16>
    %c0_8 = arith.constant 0 : index
    %c0_9 = arith.constant 0 : index
    %9 = vector.load %arg8[%c0_8, %c0_9] : memref<64x32xbf16, #tpu.memory_space<vmem>>, vector<64x32xbf16>
    %cst = arith.constant dense<0.000000e+00> : vector<64x16xf32>
    %10 = tpu.matmul %9, %8, %cst {dimension_numbers = #tpu.dot_dimension_numbers<[1], [0], [0], [1], [0, 0, 1, 1], [], []>} : vector<64x32xbf16>, vector<32x16xbf16>, vector<64x16xf32> -> vector<64x16xf32>
    %11 = vector.extract_strided_slice %10 {offsets = [0, 0], sizes = [32, 16], strides = [1, 1]} : vector<64x16xf32> to vector<32x16xf32>
    %12 = vector.extract_strided_slice %10 {offsets = [32, 0], sizes = [32, 16], strides = [1, 1]} : vector<64x16xf32> to vector<32x16xf32>
    %c0_10 = arith.constant 0 : index
    %c0_11 = arith.constant 0 : index
    %13 = vector.load %arg5[%c0_10, %c0_11] : memref<32x4xbf16, #tpu.memory_space<vmem>>, vector<32x4xbf16>
    %cst_12 = arith.constant dense<0.000000e+00> : vector<32x16xf32>
    %14 = tpu.matmul %13, %2, %cst_12 {dimension_numbers = #tpu.dot_dimension_numbers<[1], [0], [0], [1], [0, 0, 1, 1], [], []>} : vector<32x4xbf16>, vector<4x16xbf16>, vector<32x16xf32> -> vector<32x16xf32>
    %c0_13 = arith.constant 0 : index
    %c0_14 = arith.constant 0 : index
    %15 = vector.load %arg6[%c0_13, %c0_14] : memref<32x4xbf16, #tpu.memory_space<vmem>>, vector<32x4xbf16>
    %cst_15 = arith.constant dense<0.000000e+00> : vector<32x16xf32>
    %16 = tpu.matmul %15, %5, %cst_15 {dimension_numbers = #tpu.dot_dimension_numbers<[1], [0], [0], [1], [0, 0, 1, 1], [], []>} : vector<32x4xbf16>, vector<4x16xbf16>, vector<32x16xf32> -> vector<32x16xf32>
    %17 = arith.addf %14, %16 : vector<32x16xf32>
    %18 = arith.addf %17, %11 : vector<32x16xf32>
    %c0_16 = arith.constant 0 : index
    %c0_17 = arith.constant 0 : index
    %19 = vector.load %arg7[%c0_16, %c0_17] : memref<32x1xf32, #tpu.memory_space<vmem>>, vector<32x1xf32>
    %20 = vector.broadcast %19 : vector<32x1xf32> to vector<32x16xf32>
    %21 = arith.addf %18, %20 : vector<32x16xf32>
    %c0_18 = arith.constant 0 : index
    %c0_19 = arith.constant 0 : index
    %22 = vector.load %arg9[%c0_18, %c0_19] : memref<64x32xbf16, #tpu.memory_space<vmem>>, vector<64x32xbf16>
    %23 = arith.truncf %21 : vector<32x16xf32> to vector<32x16xbf16>
    %cst_20 = arith.constant dense<0.000000e+00> : vector<64x16xf32>
    %24 = tpu.matmul %22, %23, %cst_20 {dimension_numbers = #tpu.dot_dimension_numbers<[1], [0], [0], [1], [0, 0, 1, 1], [], []>} : vector<64x32xbf16>, vector<32x16xbf16>, vector<64x16xf32> -> vector<64x16xf32>
    %25 = arith.truncf %24 : vector<64x16xf32> to vector<64x16xbf16>
    %26 = vector.extract_strided_slice %25 {offsets = [0, 0], sizes = [32, 16], strides = [1, 1]} : vector<64x16xbf16> to vector<32x16xbf16>
    %c0_21 = arith.constant 0 : index
    %c0_22 = arith.constant 0 : index
    %c0_23 = arith.constant 0 : index
    %27 = vector.load %arg4[%c0_21, %c0_22, %c0_23] : memref<2x16x16xbf16, #tpu.memory_space<vmem>>, vector<1x16x16xbf16>
    %28 = vector.shape_cast %27 : vector<1x16x16xbf16> to vector<16x16xbf16>
    %cst_24 = arith.constant dense<0.000000e+00> : vector<32x16xf32>
    %29 = tpu.matmul %26, %28, %cst_24 {dimension_numbers = #tpu.dot_dimension_numbers<[1], [0], [0], [1], [0, 0, 1, 1], [], []>} : vector<32x16xbf16>, vector<16x16xbf16>, vector<32x16xf32> -> vector<32x16xf32>
    %30 = vector.extract_strided_slice %25 {offsets = [32, 0], sizes = [32, 16], strides = [1, 1]} : vector<64x16xbf16> to vector<32x16xbf16>
    %c1 = arith.constant 1 : index
    %c0_25 = arith.constant 0 : index
    %c0_26 = arith.constant 0 : index
    %31 = vector.load %arg4[%c1, %c0_25, %c0_26] : memref<2x16x16xbf16, #tpu.memory_space<vmem>>, vector<1x16x16xbf16>
    %32 = vector.shape_cast %31 : vector<1x16x16xbf16> to vector<16x16xbf16>
    %cst_27 = arith.constant dense<0.000000e+00> : vector<32x16xf32>
    %33 = tpu.matmul %30, %32, %cst_27 {dimension_numbers = #tpu.dot_dimension_numbers<[1], [0], [0], [1], [0, 0, 1, 1], [], []>} : vector<32x16xbf16>, vector<16x16xbf16>, vector<32x16xf32> -> vector<32x16xf32>
    %34 = arith.addf %29, %33 : vector<32x16xf32>
    %35 = arith.addf %34, %12 : vector<32x16xf32>
    %c0_28 = arith.constant 0 : index
    %c0_29 = arith.constant 0 : index
    %36 = vector.load %arg10[%c0_28, %c0_29] : memref<32x1xf32, #tpu.memory_space<vmem>>, vector<32x1xf32>
    %37 = vector.broadcast %36 : vector<32x1xf32> to vector<32x16xf32>
    %38 = arith.addf %35, %37 : vector<32x16xf32>
    %c0_30 = arith.constant 0 : index
    %39 = memref.load %arg14[%c0_30] : memref<1xf32, #tpu.memory_space<smem>>
    %cst_31 = arith.constant 0.000000e+00 : f32
    %40 = vector.broadcast %cst_31 : f32 to vector<32x16xf32>
    %41 = arith.cmpf oge, %38, %40 : vector<32x16xf32>
    %42 = vector.broadcast %39 : f32 to vector<32x16xf32>
    %43 = arith.mulf %42, %38 : vector<32x16xf32>
    %44 = arith.select %41, %38, %43 : vector<32x16xi1>, vector<32x16xf32>
    %c0_32 = arith.constant 0 : index
    %c0_33 = arith.constant 0 : index
    %c0_34 = arith.constant 0 : index
    %45 = vector.load %arg16[%c0_32, %c0_33, %c0_34] : memref<1x64x16xf32, #tpu.memory_space<vmem>>, vector<1x32x16xf32>
    %46 = vector.shape_cast %45 : vector<1x32x16xf32> to vector<32x16xf32>
    %47 = vector.shape_cast %44 : vector<32x16xf32> to vector<1x32x16xf32>
    tpu.vector_store %arg16[%c0_32, %c0_33, %c0_34], %47 {strides = array<i32>} : memref<1x64x16xf32, #tpu.memory_space<vmem>>, vector<1x32x16xf32>,
    %c0_35 = arith.constant 0 : index
    %c32 = arith.constant 32 : index
    %c0_36 = arith.constant 0 : index
    %48 = vector.load %arg16[%c0_35, %c32, %c0_36] : memref<1x64x16xf32, #tpu.memory_space<vmem>>, vector<1x32x16xf32>
    %49 = vector.shape_cast %48 : vector<1x32x16xf32> to vector<32x16xf32>
    %50 = vector.shape_cast %7 : vector<32x16xf32> to vector<1x32x16xf32>
    tpu.vector_store %arg16[%c0_35, %c32, %c0_36], %50 {strides = array<i32>} : memref<1x64x16xf32, #tpu.memory_space<vmem>>, vector<1x32x16xf32>,
    %c0_37 = arith.constant 0 : index
    %c0_38 = arith.constant 0 : index
    %51 = vector.load %arg11[%c0_37, %c0_38] : memref<4x32xbf16, #tpu.memory_space<vmem>>, vector<4x32xbf16>
    %52 = arith.truncf %44 : vector<32x16xf32> to vector<32x16xbf16>
    %cst_39 = arith.constant dense<0.000000e+00> : vector<4x16xf32>
    %53 = tpu.matmul %51, %52, %cst_39 {dimension_numbers = #tpu.dot_dimension_numbers<[1], [0], [0], [1], [0, 0, 1, 1], [], []>} : vector<4x32xbf16>, vector<32x16xbf16>, vector<4x16xf32> -> vector<4x16xf32>
    %c0_40 = arith.constant 0 : index
    %c0_41 = arith.constant 0 : index
    %54 = vector.load %arg12[%c0_40, %c0_41] : memref<4x32xbf16, #tpu.memory_space<vmem>>, vector<4x32xbf16>
    %cst_42 = arith.constant dense<0.000000e+00> : vector<4x16xf32>
    %55 = tpu.matmul %54, %8, %cst_42 {dimension_numbers = #tpu.dot_dimension_numbers<[1], [0], [0], [1], [0, 0, 1, 1], [], []>} : vector<4x32xbf16>, vector<32x16xbf16>, vector<4x16xf32> -> vector<4x16xf32>
    %56 = arith.addf %53, %55 : vector<4x16xf32>
    %c0_43 = arith.constant 0 : index
    %c0_44 = arith.constant 0 : index
    %57 = vector.load %arg13[%c0_43, %c0_44] : memref<4x1xf32, #tpu.memory_space<vmem>>, vector<4x1xf32>
    %58 = vector.broadcast %57 : vector<4x1xf32> to vector<4x16xf32>
    %59 = arith.addf %56, %58 : vector<4x16xf32>
    %c0_45 = arith.constant 0 : index
    %c0_46 = arith.constant 0 : index
    %c0_47 = arith.constant 0 : index
    %60 = vector.load %arg15[%c0_45, %c0_46, %c0_47] : memref<1x4x16xf32, #tpu.memory_space<vmem>>, vector<1x4x16xf32>
    %61 = vector.shape_cast %60 : vector<1x4x16xf32> to vector<4x16xf32>
    %62 = vector.shape_cast %59 : vector<4x16xf32> to vector<1x4x16xf32>
    tpu.vector_store %arg15[%c0_45, %c0_46, %c0_47], %62 {strides = array<i32>} : memref<1x4x16xf32, #tpu.memory_space<vmem>>, vector<1x4x16xf32>,
    return
  }
  func.func @transform_0(%arg0: i32) -> (i32, i32, i32) {
    %c0_i32 = arith.constant 0 : i32
    %c0_i32_0 = arith.constant 0 : i32
    %c0_i32_1 = arith.constant 0 : i32
    return %arg0, %c0_i32, %c0_i32_0 : i32, i32, i32
  }
  func.func @transform_1(%arg0: i32) -> (i32, i32, i32) {
    %c0_i32 = arith.constant 0 : i32
    %c0_i32_0 = arith.constant 0 : i32
    %c0_i32_1 = arith.constant 0 : i32
    return %arg0, %c0_i32, %c0_i32_0 : i32, i32, i32
  }
  func.func @transform_2(%arg0: i32) -> (i32, i32, i32) {
    %c0_i32 = arith.constant 0 : i32
    %c0_i32_0 = arith.constant 0 : i32
    %c0_i32_1 = arith.constant 0 : i32
    return %arg0, %c0_i32, %c0_i32_0 : i32, i32, i32
  }
  func.func @transform_3(%arg0: i32) -> (i32, i32, i32) {
    %c0_i32 = arith.constant 0 : i32
    %c0_i32_0 = arith.constant 0 : i32
    %c0_i32_1 = arith.constant 0 : i32
    %c0_i32_2 = arith.constant 0 : i32
    return %c0_i32, %c0_i32_0, %c0_i32_1 : i32, i32, i32
  }
  func.func @transform_4(%arg0: i32) -> (i32, i32) {
    %c0_i32 = arith.constant 0 : i32
    %c0_i32_0 = arith.constant 0 : i32
    %c0_i32_1 = arith.constant 0 : i32
    return %c0_i32, %c0_i32_0 : i32, i32
  }
  func.func @transform_5(%arg0: i32) -> (i32, i32) {
    %c0_i32 = arith.constant 0 : i32
    %c0_i32_0 = arith.constant 0 : i32
    %c0_i32_1 = arith.constant 0 : i32
    return %c0_i32, %c0_i32_0 : i32, i32
  }
  func.func @transform_6(%arg0: i32) -> (i32, i32) {
    %c0_i32 = arith.constant 0 : i32
    %c0_i32_0 = arith.constant 0 : i32
    %c0_i32_1 = arith.constant 0 : i32
    return %c0_i32, %c0_i32_0 : i32, i32
  }
  func.func @transform_7(%arg0: i32) -> (i32, i32) {
    %c0_i32 = arith.constant 0 : i32
    %c0_i32_0 = arith.constant 0 : i32
    %c0_i32_1 = arith.constant 0 : i32
    return %c0_i32, %c0_i32_0 : i32, i32
  }
  func.func @transform_8(%arg0: i32) -> (i32, i32) {
    %c0_i32 = arith.constant 0 : i32
    %c0_i32_0 = arith.constant 0 : i32
    %c0_i32_1 = arith.constant 0 : i32
    return %c0_i32, %c0_i32_0 : i32, i32
  }
  func.func @transform_9(%arg0: i32) -> (i32, i32) {
    %c0_i32 = arith.constant 0 : i32
    %c0_i32_0 = arith.constant 0 : i32
    %c0_i32_1 = arith.constant 0 : i32
    return %c0_i32, %c0_i32_0 : i32, i32
  }
  func.func @transform_10(%arg0: i32) -> (i32, i32) {
    %c0_i32 = arith.constant 0 : i32
    %c0_i32_0 = arith.constant 0 : i32
    %c0_i32_1 = arith.constant 0 : i32
    return %c0_i32, %c0_i32_0 : i32, i32
  }
  func.func @transform_11(%arg0: i32) -> (i32, i32) {
    %c0_i32 = arith.constant 0 : i32
    %c0_i32_0 = arith.constant 0 : i32
    %c0_i32_1 = arith.constant 0 : i32
    return %c0_i32, %c0_i32_0 : i32, i32
  }
  func.func @transform_12(%arg0: i32) -> (i32, i32) {
    %c0_i32 = arith.constant 0 : i32
    %c0_i32_0 = arith.constant 0 : i32
    %c0_i32_1 = arith.constant 0 : i32
    return %c0_i32, %c0_i32_0 : i32, i32
  }
  func.func @transform_13(%arg0: i32) -> i32 {
    %c0_i32 = arith.constant 0 : i32
    %c0_i32_0 = arith.constant 0 : i32
    return %c0_i32 : i32
  }
  func.func @transform_14(%arg0: i32) -> (i32, i32, i32) {
    %c0_i32 = arith.constant 0 : i32
    %c0_i32_0 = arith.constant 0 : i32
    %c0_i32_1 = arith.constant 0 : i32
    return %arg0, %c0_i32, %c0_i32_0 : i32, i32, i32
  }
  func.func @transform_15(%arg0: i32) -> (i32, i32, i32) {
    %c0_i32 = arith.constant 0 : i32
    %c0_i32_0 = arith.constant 0 : i32
    %c0_i32_1 = arith.constant 0 : i32
    return %arg0, %c0_i32, %c0_i32_0 : i32, i32, i32
  }
}

</mosaic_0001>

<bundles_post_ra>
// kernel: spatial_decoder.1
= control target key start
LH: loop header
LB: loop body
LE: loop exit
PB: predicated region body
PF: predicated region fallthrough
CT: control target
= control target key end

     0   :  { %s1978_s0 = inlined_call_operand.vmem [shape: f32[2,4,16], index: 0, kind: input, shape index: {}]   ;;  %s1979_s1 = inlined_call_operand.vmem [shape: f32[2,4,16], index: 1, kind: input, shape index: {}]   ;;  %s1980_s2 = inlined_call_operand.vmem [shape: f32[2,32,16], index: 2, kind: input, shape index: {}]   ;;  %s1981_s3 = inlined_call_operand.vmem [shape: bf16[2,16,16], index: 3, kind: input, shape index: {}]   ;;  %s1982_s4 = inlined_call_operand.vmem [shape: bf16[32,4], index: 4, kind: input, shape index: {}]   ;;  %s1983_s5 = inlined_call_operand.vmem [shape: bf16[32,4], index: 5, kind: input, shape index: {}]   ;;  %s1984_s6 = inlined_call_operand.vmem [shape: f32[32,1], index: 6, kind: input, shape index: {}]   ;;  %s1985_s7 = inlined_call_operand.vmem [shape: bf16[64,32], index: 7, kind: input, shape index: {}]   ;;  %s1986_s8 = inlined_call_operand.vmem [shape: bf16[64,32], index: 8, kind: input, shape index: {}]   ;;  %s1987_s9 = inlined_call_operand.vmem [shape: f32[32,1], index: 9, kind: input, shape index: {}]   ;;  %s1988_s10 = inlined_call_operand.vmem [shape: bf16[4,32], index: 10, kind: input, shape index: {}]   ;;  %s1989_s11 = inlined_call_operand.vmem [shape: bf16[4,32], index: 11, kind: input, shape index: {}]   ;;  %s1990_s12 = inlined_call_operand.vmem [shape: f32[4,1], index: 12, kind: input, shape index: {}]   ;;  %s1991_s13 = inlined_call_operand.<no memory space> [shape: f32[1], index: 13, kind: input, shape index: {}]   ;;  %s1992_s14 = inlined_call_operand.hbm [shape: f32[2,4,16], index: 14, kind: output, shape index: {0}]   ;;  %s1993_s15 = inlined_call_operand.vmem [shape: f32[2,64,16], index: 15, kind: output, shape index: {1}]  }
   0x1   :  { %21 = sst [smem:[#allocation2]] %s1991_s13 }
   0x2   :  { %22 = vsyncpa [#allocation4], 0 }
   0x3   :  { %24 = vsyncpa [#allocation4 + $0x1], 0  ;;  %s1734_s20 = smov 0   ;;  %s1736_s21 = smov 0  }
   0x4   :  { %s1738_s22 = smov 0   ;;  %s1740_s23 = smov 0  }
   0x5 LB: > { %1998 = sst [smem:[#allocation6_spill]] %s1641_s22  ;;  %s1755_s13 = sadd.s32 4294967295, %s1645_s23   ;;  %s1645_s23 = sphi %s1740_s23, %s2005_s23   ;;  %s1641_s22 = sphi %s1738_s22, %s2007_s22   ;;  %s1637_s21 = sphi %s1736_s21, %s2009_s21   ;;  %s1633_s20 = sphi %s1734_s20, %s2008_s20  }
   0x6   : > { %s1358_s24 = sadd.s32 4294967294, %s1645_s23   ;;  %s1759_s25 = sadd.s32 1, %s1645_s23  }
   0x7   : > { %1999 = sst [smem:[#allocation7_spill]] %s1759_s25  ;;  %s346_s26 = sadd.s32 1, %s1641_s22 }
   0x8   : > { %s343_s27 = ssub.s32 %s1645_s23, %s1759_s25  ;;  %p356_p0 = scmp.ne.s32.totalorder %s1641_s22, %s1637_s21 }
   0x9   : > { %p344_p1 = scmp.eq.s32.totalorder %s343_s27, 0  ;;  %p357_p2 = scmp.eq.s32.totalorder %s1755_s13, 1 }
   0xa   : > { %p362_p3 = scmp.ne.s32.totalorder %s1637_s21, %s1633_s20  ;;  %p363_p4 = scmp.eq.s32.totalorder %s1358_s24, 1 }
   0xb   : > { %s1770_s28 = scalar_select %p344_p1, %s1641_s22, %s346_s26  }
   0xc   : > { %p1772_p5 = por %p357_p2, %p356_p0  ;;  %p1776_p6 = por %p363_p4, %p362_p3 }
   0xd   : > { %2000 = sst [smem:[#allocation8_spill]] %s1770_s28  ;;  %p1361_p7 = scmp.ge.s32.totalorder %s1645_s23, 1 }
   0xe   : > { %s2002_s30 = scalar_select %p1776_p6, 1, 0 }
   0xf   : > { %p462_p8 = scmp.lt.s32.totalorder %s1645_s23, 3 }
  0x10   : > { %2003 = sst [smem:[#allocation9_spill]] %s2002_s30 }
  0x11   : > { %p463_p9 = pnand %p1361_p7, %p462_p8 }
  0x12   : > { %p523_p10 = scmp.lt.s32.totalorder (!%p463_p9), %s1755_s13, 1  ;;  %v1569_v0 = vld [vmem:[%s1985_s7] sm:$0xff] (!%p463_p9)   ;;  %vm580_vm0 = vcmask (!%p463_p9), 261120   ;;  %vm958_vm1 = vcmask (!%p463_p9), 130048   ;;  %v1647_v4 = vmov (!%p463_p9), 0   ;;  %vm683_vm2 = vcmask (!%p463_p9), 1041408  }
  0x13   : > { %466 = sbr.rel (%p463_p9) target bundleno = 991 (0x3df), region = 76  ;;  %1443 = vmatprep.mubr.msk.bf16.mxu0 (!%p463_p9), %vm580_vm0, %v1569_v0  ;;  %1567 = vset.pattern.permute.xlu0 (!%p463_p9), %v1647_v4  ;;  %v808_v9 = vld [vmem:[%s1984_s6] sm:$0xff] (!%p463_p9)  ;;  %v810_v11 = vld [vmem:[%s1984_s6 + $0x10] sm:$0xff] (!%p463_p9)  ;;  %v809_v12 = vld [vmem:[%s1984_s6 + $0x8] sm:$0xff] (!%p463_p9)  ;;  %vm676_vm3 = vcmask (!%p463_p9), 31744   ;;  %v1648_v54 = vmov (!%p463_p9), 0.0  }
  0x14   : > { %1568 = vset.pattern.permute.xlu1 (!%p463_p9), %v1647_v4  ;;  %814 = vperm.xlu0 (!%p463_p9), %1567, %v808_v9   ;;  %v1570_v13 = vld [vmem:[%s1985_s7 + $0x8] sm:$0xff] (!%p463_p9)   ;;  %v811_v16 = vld [vmem:[%s1984_s6 + $0x18] sm:$0xff] (!%p463_p9)  ;;  %v1571_v17 = vld [vmem:[%s1983_s5] sm:$0xff] (!%p463_p9)   ;;  %vm1649_vm4 = vmmov (!%p463_p9), 0   ;;  %s513_s26 = sand.u32 (!%p463_p9), 1, %s1637_s21   ;;  %vm1226_vm9 = vcmask (!%p463_p9), 125952  }
  0x15   : > { %824 = vperm.xlu1 (!%p463_p9), %1568, %v810_v11   ;;  %v1079_v18 = vld [vmem:[%s1987_s9] sm:$0xff] (!%p463_p9)  ;;  %v1080_v19 = vld [vmem:[%s1987_s9 + $0x8] sm:$0xff] (!%p463_p9)  ;;  %v1081_v21 = vld [vmem:[%s1987_s9 + $0x10] sm:$0xff] (!%p463_p9)  ;;  %s1362_s27 = sshll.u32 (!%p463_p9), %s513_s26, 2 }
  0x16   : > { %v1082_v22 = vld [vmem:[%s1987_s9 + $0x18] sm:$0xff] (!%p463_p9)  ;;  %v1219_v23 = vld [vmem:[%s1990_s12] sm:$0xf] (!%p463_p9)  ;;  %v1572_v24 = vld [vmem:[%s1983_s5 + $0x8] sm:$0xff] (!%p463_p9)  }
  0x17   : > { %v1573_v25 = vld [vmem:[%s1982_s4] sm:$0xff] (!%p463_p9)   ;;  %v1574_v27 = vld [vmem:[%s1982_s4 + $0x8] sm:$0xff] (!%p463_p9)   ;;  %v1575_v28 = vld [vmem:[%s1985_s7 + $0x10] sm:$0xff] (!%p463_p9)  }
  0x18   : > { %819 = vperm.xlu0 (!%p463_p9), %1567, %v809_v12   ;;  %v1576_v29 = vld [vmem:[%s1985_s7 + $0x18] sm:$0xff] (!%p463_p9)   ;;  %1447 = vmatprep.mubr.msk.bf16.mxu1 (!%p463_p9), %vm580_vm0, %v1575_v28  ;;  %v1577_v30 = vld [vmem:[%s1986_s8] sm:$0xff] (!%p463_p9)   ;;  %v1578_v45 = vld [vmem:[%s1986_s8 + $0x8] sm:$0xff] (!%p463_p9)  }
  0x19   : > { %829 = vperm.xlu1 (!%p463_p9), %1568, %v811_v16   ;;  %v1579_v46 = vld [vmem:[%s1986_s8 + $0x10] sm:$0xff] (!%p463_p9)   ;;  %v1580_v47 = vld [vmem:[%s1986_s8 + $0x18] sm:$0xff] (!%p463_p9)   ;;  %v1581_v52 = vld [vmem:[%s1981_s3 + $0x8] sm:$0xff] (!%p463_p9)  }
  0x1a   : > { %s524_s18 = scalar_select %p523_p10, %s1755_s13, 1  ;;  %v1582_v53 = vld [vmem:[%s1981_s3] sm:$0xff]  }
  0x1c   : > { %s1407_s19 = sshll.u32 %s524_s18, 5  ;;  %s1408_s24 = sshll.u32 %s524_s18, 6  ;;  %1085 = vperm.xlu0 %1567, %v1079_v18  }
  0x1d   : > { %s535_s28 = scalar_lea.vmem %s1980_s2, %s1407_s19  ;;  %s1794_s30 = scalar_lea.vmem %s1993_s15, %s1408_s24  ;;  %1090 = vperm.xlu1 %1568, %v1080_v19  }
  0x1e   : > { %v546_v1 = vld [vmem:[%s535_s28] sm:$0xff]  ;;  %v547_v2 = vld [vmem:[%s535_s28 + $0x8] sm:$0xff]  ;;  %v548_v3 = vld [vmem:[%s535_s28 + $0x10] sm:$0xff]  ;;  %s1363_s16 = sshll.u32 %s524_s18, 2  ;;  %s1650_s18 = smov [#allocation3]  }
  0x1f   : > { %v1796_v5 = vpack.c.bf16 %v547_v2, %v546_v1  ;;  %1125 = vst.msk [vmem:[%s1794_s30 + $0x20] sm:$0xff] %vm958_vm1, %v546_v1  ;;  %1126 = vst.msk [vmem:[%s1794_s30 + $0x28] sm:$0xff] %vm958_vm1, %v547_v2  ;;  %v549_v6 = vld [vmem:[%s535_s28 + $0x18] sm:$0xff]  ;;  %s530_s17 = scalar_lea.vmem %s1979_s1, %s1363_s16  ;;  %s526_s24 = scalar_lea.vmem %s1978_s0, %s1363_s16 }
  0x20   : > { %1127 = vst.msk [vmem:[%s1794_s30 + $0x30] sm:$0xff] %vm958_vm1, %v548_v3  ;;  %v1807_v7 = vpack.c.bf16 %v549_v6, %v548_v3  ;;  %1128 = vst.msk [vmem:[%s1794_s30 + $0x38] sm:$0xff] %vm958_vm1, %v549_v6  ;;  %v544_v8 = vld [vmem:[%s530_s17] sm:$0xf]  ;;  %1095 = vperm.xlu0 %1567, %v1081_v21   ;;  %s1107_s16 = sld [smem:[#allocation2]]  ;;  %s1404_s28 = sshll.u32 %s1755_s13, 6 }
  0x21   : > { %1439 = vmatprep.subr.bf16.mxu0 %v1796_v5  ;;  %v545_v10 = vpack.c.bf16 %v544_v8, %v544_v8  ;;  %v542_v15 = vld [vmem:[%s526_s24] sm:$0xf]  ;;  %1503 = vmatprep.subr.bf16.mxu1 %v1796_v5  ;;  %s1936_s17 = scalar_lea.hbm %s1992_s14, %s1404_s28  ;;  %s1229_s13 = scalar_lea.sflag [#allocation4], %s513_s26 }
  0x22   : > { %1440 = vmatpush3.bf16.msra.mxu0 %v1796_v5  ;;  %1505 = vmatpush3.bf16.msra.mxu1 %v1796_v5  ;;  %v543_v20 = vpack.c.bf16 %v542_v15, %v542_v15  ;;  %v1132_v3 = vld [vmem:[%s1989_s11] sm:$0x3]  ;;  %s1587_s19 = sshll.u32 %s1650_s18, 4  ;;  %s1588_s19 = int_to_ptr.vmem [resolvable:$false] %s1587_s19 }
  0x23   : > { %1441 = vmatprep.subr.bf16.mxu0 %v1807_v7  ;;  %v685_v14 = vsel %vm683_vm2, %v545_v10, 0  ;;  %1504 = vmatprep.subr.bf16.mxu1 %v1807_v7 }
  0x24   : > { %1100 = vperm.xlu1 %1568, %v1082_v22   ;;  %1222 = vperm.xlu0 %1567, %v1219_v23   ;;  %v753_v26 = vsel %vm683_vm2, %v543_v20, 0 }
  0x26   : > { %1442 = vmatpush3.bf16.msra.mxu0 %v1807_v7  ;;  %1506 = vmatpush3.bf16.msra.mxu1 %v1807_v7 }
  0x27   : > { %1523 = vmatprep.subr.msk.bf16.mxu0 %vm683_vm2, %v545_v10  ;;  %v1112_v10 = vstv %s1107_s16 }
  0x29   : > { %1444 = vmatmul.mubr.msk.bf16.vlgmr.msra.gmra.mrb[0].mxu0 %vm580_vm0, %v1570_v13  ;;  %1448 = vmatmul.mubr.msk.bf16.vlgmr.msra.gmra.mrb[0].mxu1 %vm580_vm0, %v1576_v29 }
  0x2a   : > { %1452 = vmatpush3.bf16.msra.mxu0 %v685_v14  ;;  %1453 = vmatprep.mubr.msk.bf16.mxu0 %vm676_vm3, %v1571_v17 }
  0x2b   : > { %1524 = vmatprep.subr.msk.bf16.mxu0 %vm683_vm2, %v543_v20  ;;  %1467 = vmatprep.mubr.msk.bf16.mxu1 %vm580_vm0, %v1577_v30 }
  0x35   : > { %1454 = vmatmul.mubr.msk.bf16.vlgmr.msra.gmra.mrb[0].mxu0 %vm676_vm3, %v1572_v24 }
  0x36   : > { %1458 = vmatpush3.bf16.msra.mxu0 %v753_v26  ;;  %1459 = vmatprep.mubr.msk.bf16.mxu0 %vm676_vm3, %v1573_v25 }
  0x37   : > { %1475 = vmatprep.subr.bf16.mxu0 %v1581_v52 }
  0x41   : > { %1460 = vmatmul.mubr.msk.bf16.vlgmr.msra.gmra.mrb[0].mxu0 %vm676_vm3, %v1574_v27 }
  0x42   : > { %1476 = vmatpush3.bf16.msra.mxu0 %v1581_v52 }
  0x43   : > { %1481 = vmatprep.subr.bf16.mxu0 %v1582_v53 }
  0x93   : > { %v815_v32 = vpop.permute.xlu0 %814 }
  0x94   : > { %v825_v31 = vpop.permute.xlu1 %824 }
  0x97   : > { %v820_v37 = vpop.permute.xlu0 %819 }
  0x98   : > { %v830_v35 = vpop.permute.xlu1 %829 }
  0x9b   : > { %v1086_v4 = vpop.permute.xlu0 %1085 }
  0x9f   : > { %v1096_v9 = vpop.permute.xlu0 %1095 }
  0xfc   : > { %v1449_v48 = vpop.f32.mrb[0].mxu1 }
  0xfd   : > { %v643_v49 = vpop.f32.mrb[1].mxu1 }
  0xfe   : > { %v1450_v50 = vpop.f32.mrb[2].mxu1 }
  0xff   : > { %v646_v51 = vpop.f32.mrb[3].mxu1 }
 0x114   : > { %v1461_v33 = vpop.f32.mrb[0].mxu0 }
 0x115   : > { %v789_v34 = vpop.f32.mrb[1].mxu0  ;;  %v834_v38 = vadd.f32 %v1461_v33, %v825_v31  ;;  %v1129_v31 = vld [vmem:[%s1988_s10] sm:$0x3] }
 0x116   : > { %v1462_v36 = vpop.f32.mrb[2].mxu0  ;;  %v832_v41 = vadd.f32 %v815_v32, %v789_v34 }
 0x117   : > { %v835_v39 = vadd.f32 %v1462_v36, %v830_v35  ;;  %v792_v40 = vpop.f32.mrb[3].mxu0 }
 0x118   : > { %v833_v42 = vadd.f32 %v820_v37, %v792_v40 }
 0x119   : > { %v845_v43 = vpack.c.bf16 %v835_v39, %v834_v38  ;;  %v1223_v39 = vpop.permute.xlu0 %1222 }
 0x11a   : > { %v844_v44 = vpack.c.bf16 %v833_v42, %v832_v41 }
 0x11c   : > { %1463 = vmatprep.subr.bf16.mxu1 %v844_v44 }
 0x11d   : > { %1464 = vmatpush3.bf16.msra.mxu1 %v844_v44 }
 0x11e   : > { %1465 = vmatprep.subr.bf16.mxu1 %v845_v43 }
 0x121   : > { %1466 = vmatpush3.bf16.msra.mxu1 %v845_v43 }
 0x122   : > { %1487 = vmatprep.subr.bf16.mxu1 %v1648_v54 }
 0x124   : > { %1468 = vmatmul.mubr.msk.bf16.vlgmr.msra.gmra.mrb[4].mxu1 %vm580_vm0, %v1578_v45 }
 0x125   : > { %1471 = vmatprep.mubr.msk.bf16.mxu1 %vm580_vm0, %v1579_v46  ;;  %1488 = vmatpush3.bf16.msra.mxu1 %v1796_v5  ;;  %v1091_v5 = vpop.permute.xlu1 %1090 }
 0x126   : > { %1489 = vmatprep.subr.bf16.mxu1 %v1648_v54 }
 0x129   : > { %1490 = vmatpush3.bf16.msra.mxu1 %v1807_v7  ;;  %v1101_v16 = vpop.permute.xlu1 %1100 }
 0x12a   : > { %1495 = vmatprep.subr.bf16.mxu1 %v1648_v54 }
 0x12c   : > { %1472 = vmatmul.mubr.msk.bf16.gmra.mrb[8].mxu1 %vm580_vm0, %v1580_v47 }
 0x12d   : > { %1491 = vmatprep.mubr.msk.bf16.mxu1 %vm1649_vm4, %v1648_v54 }
 0x134   : > { %1492 = vmatmul.mubr.msk.bf16.vlgmr.msra.gmra.mrb[12].mxu1 %vm580_vm0, %v1132_v3 }
 0x135   : > { %1499 = vmatprep.mubr.msk.bf16.mxu1 %vm1649_vm4, %v1648_v54 }
 0x1f7   : > { %v1469_v55 = vpop.f32.mrb[4].mxu1 }
 0x1f8   : > { %v912_v56 = vpop.f32.mrb[5].mxu1 }
 0x1f9   : > { %v1470_v57 = vpop.f32.mrb[6].mxu1 }
 0x1fa   : > { %v944_v58 = vpack.c.bf16 %v1470_v57, %v1469_v55  ;;  %v915_v59 = vpop.f32.mrb[7].mxu1 }
 0x1fb   : > { %v943_v60 = vpack.c.bf16 %v915_v59, %v912_v56 }
 0x1ff   : > { %v1473_v61 = vpop.f32.mrb[8].mxu1 }
 0x200   : > { %v928_v62 = vpop.f32.mrb[9].mxu1 }
 0x201   : > { %v1474_v63 = vpop.f32.mrb[10].mxu1 }
 0x202   : > { %v946_v0 = vpack.c.bf16 %v1474_v63, %v1473_v61  ;;  %v931_v1 = vpop.f32.mrb[11].mxu1 }
 0x203   : > { %v945_v2 = vpack.c.bf16 %v931_v1, %v928_v62 }
 0x205   : > { %1477 = vmatprep.mubr.msk.bf16.mxu0 %vm958_vm1, %v945_v2 }
 0x206   : > { %1478 = vmatmul.mubr.msk.bf16.vlgmr.msra.gmra.mrb[4].mxu0 %vm958_vm1, %v946_v0 }
 0x207   : > { %1482 = vmatpush3.bf16.msra.mxu0 %v1582_v53  ;;  %1483 = vmatprep.mubr.msk.bf16.mxu0 %vm958_vm1, %v943_v60  ;;  %v1170_v32 = vpop.f32.mrb[12].mxu1 }
 0x208   : > { %v1493_v33 = vpop.f32.mrb[13].mxu1 }
 0x209   : > { %v1173_v34 = vpop.f32.mrb[14].mxu1 }
 0x20a   : > { %v1494_v35 = vpop.f32.mrb[15].mxu1 }
 0x212   : > { %1484 = vmatmul.mubr.msk.bf16.vlgmr.msra.gmra.mrb[4].mxu0 %vm958_vm1, %v944_v58 }
 0x2e5   : > { %v1485_v6 = vpop.f32.mrb[4].mxu0 }
 0x2e6   : > { %v1507_v7 = vadd.f32 %v1485_v6, %v1449_v48  ;;  %v1060_v8 = vpop.f32.mrb[5].mxu0 }
 0x2e7   : > { %v1508_v11 = vadd.f32 %v1060_v8, %v643_v49  ;;  %v1486_v12 = vpop.f32.mrb[6].mxu0 }
 0x2e8   : > { %v1105_v13 = vadd.f32 %v1507_v7, %v1096_v9  ;;  %v1509_v14 = vadd.f32 %v1486_v12, %v1450_v50  ;;  %v1063_v15 = vpop.f32.mrb[7].mxu0 }
 0x2e9   : > { %v1103_v17 = vadd.f32 %v1508_v11, %v1086_v4  ;;  %v1510_v18 = vadd.f32 %v1063_v15, %v646_v51 }
 0x2ea   : > { %vm1110_vm5 = vcmp.ge.f32.partialorder %v1105_v13, 0.0  ;;  %v1115_v19 = vmul.f32 %v1112_v10, %v1105_v13  ;;  %v1106_v20 = vadd.f32 %v1509_v14, %v1101_v16 }
 0x2eb   : > { %vm1108_vm6 = vcmp.ge.f32.partialorder %v1103_v17, 0.0  ;;  %v1113_v21 = vmul.f32 %v1112_v10, %v1103_v17  ;;  %v1104_v22 = vadd.f32 %v1510_v18, %v1091_v5 }
 0x2ec   : > { %v1119_v23 = vsel %vm1110_vm5, %v1105_v13, %v1115_v19  ;;  %vm1111_vm7 = vcmp.ge.f32.partialorder %v1106_v20, 0.0  ;;  %v1116_v24 = vmul.f32 %v1112_v10, %v1106_v20 }
 0x2ed   : > { %1123 = vst.msk [vmem:[%s1794_s30 + $0x10] sm:$0xff] %vm958_vm1, %v1119_v23  ;;  %v1117_v25 = vsel %vm1108_vm6, %v1103_v17, %v1113_v21  ;;  %vm1109_vm8 = vcmp.ge.f32.partialorder %v1104_v22, 0.0  ;;  %v1114_v26 = vmul.f32 %v1112_v10, %v1104_v22 }
 0x2ee   : > { %1121 = vst.msk [vmem:[%s1794_s30] sm:$0xff] %vm958_vm1, %v1117_v25  ;;  %v1120_v27 = vsel %vm1111_vm7, %v1106_v20, %v1116_v24 }
 0x2ef   : > { %1124 = vst.msk [vmem:[%s1794_s30 + $0x18] sm:$0xff] %vm958_vm1, %v1120_v27  ;;  %v1118_v28 = vsel %vm1109_vm8, %v1104_v22, %v1114_v26  ;;  %v1131_v29 = vpack.c.bf16 %v1120_v27, %v1119_v23 }
 0x2f0   : > { %1122 = vst.msk [vmem:[%s1794_s30 + $0x8] sm:$0xff] %vm958_vm1, %v1118_v28  ;;  %v1130_v30 = vpack.c.bf16 %v1118_v28, %v1117_v25  ;;  %s515_s30 = scalar_lea.vmem [#allocation3], %s1362_s27  ;;  %s1589_s27 = scalar_lea.vmem %s1588_s19, 128 }
 0x2f1   : > { %s1247_s22 = sshll.u32 %s515_s30, 4  ;;  %s1938_s22 = int_to_ptr.vmem [resolvable:$true] %s1247_s22 }
 0x2f2   : > { %1496 = vmatpush3.bf16.msra.mxu1 %v1130_v30  ;;  %s1583_s16 = scalar_lea.vmem %s1938_s22, 64  ;;  %p1590_p0 = scmp.lt.s32.totalorder %s1938_s22, %s1588_s19 }
 0x2f3   : > { %1497 = vmatprep.subr.bf16.mxu1 %v1648_v54  ;;  %p1584_p11 = scmp.ne.s32.totalorder %s1938_s22, %s1583_s16  ;;  %p1591_p1 = scmp.lt.s32.totalorder %s1589_s27, %s1583_s16 }
 0x2f5   : > { %p1585_p12 = pnand %p1584_p11, %p1772_p5  ;;  %p1592_p2 = por %p1591_p1, %p1590_p0 }
 0x2f6   : > { %1498 = vmatpush3.bf16.msra.mxu1 %v1131_v29 }
 0x2f7   : > { %p1586_p13 = pneg %p1585_p12 }
 0x2f9   : > { %1500 = vmatmul.mubr.msk.bf16.vlgmr.msra.gmra.mrb[16].mxu1 %vm580_vm0, %v1129_v31  ;;  %p1593_p3 = pnand %p1592_p2, %p1586_p13 }
 0x3cc   : > { %v1213_v36 = vpop.f32.mrb[16].mxu1 }
 0x3cd   : > { %v1214_v37 = vadd.f32 %v1213_v36, %v1170_v32  ;;  %v1501_v38 = vpop.f32.mrb[17].mxu1 }
 0x3ce   : > { %v1216_v40 = vpop.f32.mrb[18].mxu1 }
 0x3cf   : > { %v1225_v41 = vadd.f32 %v1223_v39, %v1214_v37  ;;  %v1502_v42 = vpop.f32.mrb[19].mxu1 }
 0x3d1   : > { %1227 = vst.msk [vmem:[%s515_s30] sm:$0xf] %vm1226_vm9, %v1225_v41 }
 0x3d2   : > { %1596 = shalt.err (!%p1593_p3)
}
 0x3d3   : > { %s1597_s26 = scalar_lea.hbm %s1936_s17, 64  ;;  %s1601_s25 = scalar_lea.hbm %s1992_s14, 128 }
 0x3d4   : > { %p1598_p4 = scmp.ne.s32.totalorder %s1936_s17, %s1597_s26  ;;  %p1602_p9 = scmp.lt.u32.totalorder %s1936_s17, %s1992_s14 }
 0x3d5   : > { %p1603_p10 = scmp.lt.u32.totalorder %s1601_s25, %s1597_s26  ;;  %p1605_p12 = scmp.lt.u32.totalorder %s1597_s26, %s1936_s17 }
 0x3d6   : > { %p1599_p7 = pnand %p1598_p4, %p1772_p5 }
 0x3d7   : > { %p1604_p11 = por %p1603_p10, %p1602_p9 }
 0x3d8   : > { %p1600_p8 = pneg %p1599_p7 }
 0x3d9   : > { %p1606_p13 = por %p1605_p12, %p1604_p11 }
 0x3db   : > { %p1607_p0 = pnand %p1606_p13, %p1600_p8 }
 0x3dd   : > { %1610 = shalt.err (!%p1607_p0)
}
 0x3de   : > { %1525 = dma.vmem_to_hbm [thread:$0]  (%p1772_p5), %s1938_s22, 64, %s1936_s17, %s1229_s13  }
 0x3df PF: > { %p1531_p1 = scmp.ge.s32.totalorder %s1645_s23, 2  ;;  %s1262_s19 = sand.u32 1, %s1633_s20  }
 0x3e0   : > { %s1263_s27 = scalar_lea.sflag [#allocation4], %s1262_s19 }
 0x3e1   : > { %p1528_p2 = pnand %p1531_p1, %p1776_p6 }
 0x3e3   : > { %1628 = dma.done.wait (!%p1528_p2), %s1263_s27, 64  }
 0x3e4   : > { %1630 = vsyncadd (!%p1528_p2), %s1263_s27, 4294967232  ;;  %s2005_s23 = sld [smem:[#allocation7_spill]]  ;;  %s2006_s26 = sld [smem:[#allocation6_spill]] }
 0x3e5   : > { %s2007_s22 = sld [smem:[#allocation8_spill]]  ;;  %s2008_s20 = smov %s1637_s21 }
 0x3ea   : > { %p27_p3 = scmp.ge.s32.totalorder %s2005_s23, 4   ;;  %s2009_s21 = smov %s2006_s26 }
 0x3ec   :  { %29 = sbr.rel (!%p27_p3) target bundleno = 5 (0x5), region = 130 }
 0x3f3   :  { %1276 = vsyncpa [#allocation4], 1 }
 0x3f4   :  { %1278 = vsyncpa [#allocation4 + $0x1], 1 }

</bundles_post_ra>
